<compile_context>
chip_gen: v7x
topology: tpu7x:2x2x1
jax: 0.10.0
libtpu: 0.0.40
codegen_flags: <defaults>
</compile_context>

<pallas_src>
import functools

import jax
import jax.numpy as jnp
from jax.experimental import pallas as pl
from jax.experimental.pallas import tpu as pltpu

H_DIM = 128     # hidden width fixed by build_default_network
R_DIM = 64      # default r_dim
N_CORES = 2     # leading "parallel" grid axis (v7x megacore split; harmless elsewhere)


def _round_up(x, m):
    return ((x + m - 1) // m) * m


def _encoder_kernel(n_rows, tile_n, tiles_per_core, mask_tail,
                    xy_ref,
                    w1_ref, b1_ref,
                    w2_ref, b2_ref,
                    w3_ref, b3_ref,
                    w4_ref, b4_ref,
                    w5_ref, b5_ref,
                    out_ref):
    """One grid step: 5-layer MLP on (tile_n, in_dim) rows; accumulate sum(h5) per core."""
    c = pl.program_id(0)
    i = pl.program_id(1)

    # Output block index is constant along the (arbitrary) i axis -> VMEM-resident
    # accumulator; zero it on the first i step of this core.
    @pl.when(i == 0)
    def _():
        out_ref[...] = jnp.zeros_like(out_ref)

    # Layer 1: single dot (x/y concatenated host-side, in_dim zero-padded to 8).
    h = jnp.dot(xy_ref[...], w1_ref[...],
                preferred_element_type=jnp.float32) + b1_ref[...]
    h = jnp.maximum(h, 0.0).astype(jnp.bfloat16)

    # Hidden layers 2..4: bf16 activations between layers (cast after f32 bias+ReLU,
    # so elementwise work stays f32 on the VPU -> v5e-safe), f32 MXU accumulation.
    for w_ref, b_ref in ((w2_ref, b2_ref), (w3_ref, b3_ref), (w4_ref, b4_ref)):
        h = jnp.dot(h, w_ref[...],
                    preferred_element_type=jnp.float32) + b_ref[...]
        h = jnp.maximum(h, 0.0).astype(jnp.bfloat16)

    # Layer 5 output stays f32 for the masked sum-accumulate.
    h5 = jnp.dot(h, w5_ref[...],
                 preferred_element_type=jnp.float32) + b5_ref[...]
    h5 = jnp.maximum(h5, 0.0)

    # Mask zero-padded tail rows (biases make them nonzero through the MLP).
    if mask_tail:
        row_ids = ((c * tiles_per_core + i) * tile_n
                   + jax.lax.broadcasted_iota(jnp.int32, (tile_n, 1), 0))
        h5 = jnp.where(row_ids < n_rows, h5, 0.0)

    # Final linear is folded out of the per-row path: only accumulate sum(h5) here;
    # the wrapper applies W6/b6 once to the mean (exact by linearity).
    out_ref[...] += jnp.sum(h5, axis=0, keepdims=True)[None]


def deterministic_encoder(x_context, y_context, params):
    """r_c = mean(MLP(concat(x_context, y_context)), dim=0), shape (r_dim,)."""
    n, x_dim = x_context.shape
    n_y, y_dim = y_context.shape
    assert n == n_y
    (w1, b1), (w2, b2), (w3, b3), (w4, b4), (w5, b5), (w6, b6) = params
    in_dim = x_dim + y_dim
    in_dim_pad = _round_up(in_dim, 8)

    # Generation-aware sizing (v7x: 64 MiB/core -> tile 2048; v5e/v6e: 128 MiB -> 4096).
    try:
        vmem_cap = int(pltpu.get_tpu_info().vmem_capacity_bytes)
    except Exception:
        vmem_cap = 64 * 2**20
    max_tile_n = 4096 if vmem_cap > 96 * 2**20 else 2048

    # Split rows evenly across the 2-way parallel axis, then tile each half with the
    # fewest i-steps that respect max_tile_n (minimizes zero padding).
    half = -(-n // N_CORES)                              # ceil(n / 2)
    tiles_per_core = max(1, -(-half // max_tile_n))      # i-steps per core
    tile_n = max(8, _round_up(-(-half // tiles_per_core), 8))
    n_pad = N_CORES * tiles_per_core * tile_n
    mask_tail = (n_pad != n)
    grid = (N_CORES, tiles_per_core)

    # Host-side concat + pad; bf16 into the MXU.
    xy = jnp.concatenate([x_context, y_context], axis=-1)
    xy_p = (jnp.zeros((n_pad, in_dim_pad), jnp.float32)
            .at[:n, :in_dim].set(xy).astype(jnp.bfloat16))
    w1_p = (jnp.zeros((in_dim_pad, H_DIM), jnp.float32)
            .at[:in_dim].set(w1).astype(jnp.bfloat16))

    def row(b):  # biases as (1, dim) f32 rows for lane-aligned broadcast
        return b[None, :].astype(jnp.float32)

    flat_args = [xy_p,
                 w1_p, row(b1),
                 w2.astype(jnp.bfloat16), row(b2),
                 w3.astype(jnp.bfloat16), row(b3),
                 w4.astype(jnp.bfloat16), row(b4),
                 w5.astype(jnp.bfloat16), row(b5)]

    def resident(a):
        # Full-array block + constant index map -> stays VMEM-resident across steps.
        return pl.BlockSpec(a.shape, lambda c, i: (0, 0))

    in_specs = ([pl.BlockSpec((tile_n, in_dim_pad),
                              lambda c, i: (c * tiles_per_core + i, 0))]
                + [resident(a) for a in flat_args[1:]])

    # Per-core partial sums of h5. Output is (N_CORES, 1, H_DIM) so the block's last
    # two dims (1, H_DIM) equal the array's last two dims (lane-dense 128 stores).
    out_spec = pl.BlockSpec((1, 1, H_DIM), lambda c, i: (c, 0, 0))
    out_shape = jax.ShapeDtypeStruct((N_CORES, 1, H_DIM), jnp.float32)

    weight_bytes = sum(int(a.size) * a.dtype.itemsize for a in flat_args[1:])
    flops = 2 * n * (in_dim_pad * H_DIM + 4 * H_DIM * H_DIM)
    bytes_accessed = n_pad * in_dim_pad * 2 + weight_bytes + N_CORES * H_DIM * 4

    # VMEM budget: resident weights + double-buffered bf16 input tiles + generous
    # f32/bf16 activation-slab allowance + headroom, capped at 75% of core VMEM.
    tile_bytes = 2 * tile_n * in_dim_pad * 2
    act_bytes = 8 * tile_n * H_DIM * 4
    vmem_limit = int(max(16 * 2**20,
                         min(weight_bytes + tile_bytes + act_bytes + (8 << 20),
                             (3 * vmem_cap) // 4)))

    kernel = functools.partial(_encoder_kernel, n, tile_n, tiles_per_core, mask_tail)

    partials = pl.pallas_call(
        kernel,
        out_shape=out_shape,
        grid_spec=pltpu.PrefetchScalarGridSpec(
            num_scalar_prefetch=0,
            grid=grid,
            in_specs=in_specs,
            out_specs=out_spec),
        compiler_params=pltpu.CompilerParams(
            dimension_semantics=("parallel", "arbitrary"),  # cores x N-reduction
            vmem_limit_bytes=vmem_limit),
        cost_estimate=pl.CostEstimate(flops=flops, transcendentals=0,
                                      bytes_accessed=bytes_accessed),
    )(*flat_args)

    # Final linear applied once to the mean (tiny (1,128)@(128,r_dim) dot, f32).
    h5_mean = jnp.sum(partials.reshape(N_CORES, H_DIM), axis=0) / n
    return h5_mean @ w6 + b6


def init_params(key, x_dim, y_dim, r_dim=R_DIM, h_dim=H_DIM):
    """Parameter init matching the nn.Sequential shapes; weights are (in, out)."""
    in_dim = x_dim + y_dim
    dims = [(in_dim, h_dim), (h_dim, h_dim), (h_dim, h_dim),
            (h_dim, h_dim), (h_dim, h_dim), (h_dim, r_dim)]
    params = []
    for (din, dout) in dims:
        key, kw, kb = jax.random.split(key, 3)
        bound = 1.0 / jnp.sqrt(din)
        w = jax.random.uniform(kw, (din, dout), jnp.float32, -bound, bound)
        b = jax.random.uniform(kb, (dout,), jnp.float32, -bound, bound)
        params.append((w, b))
    return params


def reference_forward(x_context, y_context, params):
    """Plain-JAX f32 reference for correctness checking."""
    h = jnp.concatenate([x_context, y_context], axis=-1)
    for i, (w, b) in enumerate(params):
        h = h @ w + b
        if i < len(params) - 1:
            h = jnp.maximum(h, 0.0)
    return jnp.mean(h, axis=0)


if __name__ == "__main__":
    key = jax.random.PRNGKey(0)
    k_params, k_x, k_y = jax.random.split(key, 3)

    # Small deterministic example: 8 context points, x_dim=2, y_dim=2, r_dim=64.
    N, X_DIM, Y_DIM = 8, 2, 2
    params = init_params(k_params, X_DIM, Y_DIM, r_dim=R_DIM)
    x_context = jax.random.normal(k_x, (N, X_DIM), jnp.float32)
    y_context = jax.random.normal(k_y, (N, Y_DIM), jnp.float32)

    r_c = jax.block_until_ready(deterministic_encoder(x_context, y_context, params))
    ref = reference_forward(x_context, y_context, params)
    assert r_c.shape == (R_DIM,), r_c.shape
    # bf16 MXU inputs/activations -> relaxed tolerance vs the f32 reference.
    assert jnp.allclose(r_c, ref, atol=3e-2, rtol=3e-2), "mismatch vs reference (small)"

    # Mid case: even 2-core split, no tail padding (1200 rows -> 600 per core).
    N2 = 1200
    k_x2, k_y2 = jax.random.split(jax.random.PRNGKey(1))
    x2 = jax.random.normal(k_x2, (N2, X_DIM), jnp.float32)
    y2 = jax.random.normal(k_y2, (N2, Y_DIM), jnp.float32)
    r_c2 = jax.block_until_ready(deterministic_encoder(x2, y2, params))
    ref2 = reference_forward(x2, y2, params)
    assert r_c2.shape == (R_DIM,), r_c2.shape
    assert jnp.allclose(r_c2, ref2, atol=3e-2, rtol=3e-2), "mismatch vs reference (mid)"

    # Larger case exercises multi-step reduction per core and tail-row masking.
    N3 = 5000
    k_x3, k_y3 = jax.random.split(jax.random.PRNGKey(2))
    x3 = jax.random.normal(k_x3, (N3, X_DIM), jnp.float32)
    y3 = jax.random.normal(k_y3, (N3, Y_DIM), jnp.float32)
    r_c3 = jax.block_until_ready(deterministic_encoder(x3, y3, params))
    ref3 = reference_forward(x3, y3, params)
    assert r_c3.shape == (R_DIM,), r_c3.shape
    assert jnp.allclose(r_c3, ref3, atol=3e-2, rtol=3e-2), "mismatch vs reference (large)"

    print("KERNEL_OK")
</pallas_src>

<mosaic_0001>
module attributes {stable_mosaic.version = 11 : i64} {
  func.func @_encoder_kernel(%arg0: i32, %arg1: i32, %arg2: memref<8x8xbf16, #tpu.memory_space<vmem>>, %arg3: memref<8x128xbf16, #tpu.memory_space<vmem>>, %arg4: memref<1x128xf32, #tpu.memory_space<vmem>>, %arg5: memref<128x128xbf16, #tpu.memory_space<vmem>>, %arg6: memref<1x128xf32, #tpu.memory_space<vmem>>, %arg7: memref<128x128xbf16, #tpu.memory_space<vmem>>, %arg8: memref<1x128xf32, #tpu.memory_space<vmem>>, %arg9: memref<128x128xbf16, #tpu.memory_space<vmem>>, %arg10: memref<1x128xf32, #tpu.memory_space<vmem>>, %arg11: memref<128x128xbf16, #tpu.memory_space<vmem>>, %arg12: memref<1x128xf32, #tpu.memory_space<vmem>>, %arg13: memref<1x1x128xf32, #tpu.memory_space<vmem>>) attributes {dimension_semantics = [#tpu.dimension_semantics<parallel>, #tpu.dimension_semantics<arbitrary>], iteration_bounds = array<i64: 2, 1>, scalar_prefetch = 0 : i64, scratch_operands = 0 : i64, tpu.core_type = #tpu.core_type<tc>, window_params = [{transform_indices = @transform_0, window_bounds = array<i64: 8, 8>}, {pipeline_mode = #tpu.pipeline_mode<synchronous>, transform_indices = @transform_1, window_bounds = array<i64: 8, 128>}, {pipeline_mode = #tpu.pipeline_mode<synchronous>, transform_indices = @transform_2, window_bounds = array<i64: 1, 128>}, {pipeline_mode = #tpu.pipeline_mode<synchronous>, transform_indices = @transform_3, window_bounds = array<i64: 128, 128>}, {pipeline_mode = #tpu.pipeline_mode<synchronous>, transform_indices = @transform_4, window_bounds = array<i64: 1, 128>}, {pipeline_mode = #tpu.pipeline_mode<synchronous>, transform_indices = @transform_5, window_bounds = array<i64: 128, 128>}, {pipeline_mode = #tpu.pipeline_mode<synchronous>, transform_indices = @transform_6, window_bounds = array<i64: 1, 128>}, {pipeline_mode = #tpu.pipeline_mode<synchronous>, transform_indices = @transform_7, window_bounds = array<i64: 128, 128>}, {pipeline_mode = #tpu.pipeline_mode<synchronous>, transform_indices = @transform_8, window_bounds = array<i64: 1, 128>}, {pipeline_mode = #tpu.pipeline_mode<synchronous>, transform_indices = @transform_9, window_bounds = array<i64: 128, 128>}, {pipeline_mode = #tpu.pipeline_mode<synchronous>, transform_indices = @transform_10, window_bounds = array<i64: 1, 128>}, {transform_indices = @transform_11, window_bounds = array<i64: 1, 1, 128>}]} {
    %c0_i32 = arith.constant 0 : i32
    %0 = arith.cmpi eq, %arg1, %c0_i32 : i32
    %1 = arith.extui %0 : i1 to i32
    %c0_i32_0 = arith.constant 0 : i32
    %2 = arith.cmpi ne, %1, %c0_i32_0 : i32
    scf.if %2 {
      %cst_40 = arith.constant 0.000000e+00 : f32
      %61 = vector.broadcast %cst_40 : f32 to vector<1x1x128xf32>
      %c0_41 = arith.constant 0 : index
      %c0_42 = arith.constant 0 : index
      %c0_43 = arith.constant 0 : index
      %62 = vector.load %arg13[%c0_41, %c0_42, %c0_43] : memref<1x1x128xf32, #tpu.memory_space<vmem>>, vector<1x1x128xf32>
      tpu.vector_store %arg13[%c0_41, %c0_42, %c0_43], %61 {strides = array<i32>} : memref<1x1x128xf32, #tpu.memory_space<vmem>>, vector<1x1x128xf32>,
    } else {
    }
    %c0 = arith.constant 0 : index
    %c0_1 = arith.constant 0 : index
    %3 = vector.load %arg2[%c0, %c0_1] : memref<8x8xbf16, #tpu.memory_space<vmem>>, vector<8x8xbf16>
    %c0_2 = arith.constant 0 : index
    %c0_3 = arith.constant 0 : index
    %4 = vector.load %arg3[%c0_2, %c0_3] : memref<8x128xbf16, #tpu.memory_space<vmem>>, vector<8x128xbf16>
    %cst = arith.constant dense<0.000000e+00> : vector<8x128xf32>
    %5 = tpu.matmul %3, %4, %cst {dimension_numbers = #tpu.dot_dimension_numbers<[1], [0], [0], [1], [0, 0, 1, 1], [], []>} : vector<8x8xbf16>, vector<8x128xbf16>, vector<8x128xf32> -> vector<8x128xf32>
    %c0_4 = arith.constant 0 : index
    %c0_5 = arith.constant 0 : index
    %6 = vector.load %arg4[%c0_4, %c0_5] : memref<1x128xf32, #tpu.memory_space<vmem>>, vector<1x128xf32>
    %7 = vector.broadcast %6 : vector<1x128xf32> to vector<8x128xf32>
    %8 = arith.addf %5, %7 : vector<8x128xf32>
    %cst_6 = arith.constant 0.000000e+00 : f32
    %9 = vector.broadcast %cst_6 : f32 to vector<8x128xf32>
    %10 = arith.maximumf %8, %9 : vector<8x128xf32>
    %11 = arith.truncf %10 : vector<8x128xf32> to vector<8x128xbf16>
    %c0_7 = arith.constant 0 : index
    %c0_8 = arith.constant 0 : index
    %12 = vector.load %arg5[%c0_7, %c0_8] : memref<128x128xbf16, #tpu.memory_space<vmem>>, vector<128x128xbf16>
    %cst_9 = arith.constant dense<0.000000e+00> : vector<8x128xf32>
    %13 = tpu.matmul %11, %12, %cst_9 {dimension_numbers = #tpu.dot_dimension_numbers<[1], [0], [0], [1], [0, 0, 1, 1], [], []>} : vector<8x128xbf16>, vector<128x128xbf16>, vector<8x128xf32> -> vector<8x128xf32>
    %c0_10 = arith.constant 0 : index
    %c0_11 = arith.constant 0 : index
    %14 = vector.load %arg6[%c0_10, %c0_11] : memref<1x128xf32, #tpu.memory_space<vmem>>, vector<1x128xf32>
    %15 = vector.broadcast %14 : vector<1x128xf32> to vector<8x128xf32>
    %16 = arith.addf %13, %15 : vector<8x128xf32>
    %cst_12 = arith.constant 0.000000e+00 : f32
    %17 = vector.broadcast %cst_12 : f32 to vector<8x128xf32>
    %18 = arith.maximumf %16, %17 : vector<8x128xf32>
    %19 = arith.truncf %18 : vector<8x128xf32> to vector<8x128xbf16>
    %c0_13 = arith.constant 0 : index
    %c0_14 = arith.constant 0 : index
    %20 = vector.load %arg7[%c0_13, %c0_14] : memref<128x128xbf16, #tpu.memory_space<vmem>>, vector<128x128xbf16>
    %cst_15 = arith.constant dense<0.000000e+00> : vector<8x128xf32>
    %21 = tpu.matmul %19, %20, %cst_15 {dimension_numbers = #tpu.dot_dimension_numbers<[1], [0], [0], [1], [0, 0, 1, 1], [], []>} : vector<8x128xbf16>, vector<128x128xbf16>, vector<8x128xf32> -> vector<8x128xf32>
    %c0_16 = arith.constant 0 : index
    %c0_17 = arith.constant 0 : index
    %22 = vector.load %arg8[%c0_16, %c0_17] : memref<1x128xf32, #tpu.memory_space<vmem>>, vector<1x128xf32>
    %23 = vector.broadcast %22 : vector<1x128xf32> to vector<8x128xf32>
    %24 = arith.addf %21, %23 : vector<8x128xf32>
    %cst_18 = arith.constant 0.000000e+00 : f32
    %25 = vector.broadcast %cst_18 : f32 to vector<8x128xf32>
    %26 = arith.maximumf %24, %25 : vector<8x128xf32>
    %27 = arith.truncf %26 : vector<8x128xf32> to vector<8x128xbf16>
    %c0_19 = arith.constant 0 : index
    %c0_20 = arith.constant 0 : index
    %28 = vector.load %arg9[%c0_19, %c0_20] : memref<128x128xbf16, #tpu.memory_space<vmem>>, vector<128x128xbf16>
    %cst_21 = arith.constant dense<0.000000e+00> : vector<8x128xf32>
    %29 = tpu.matmul %27, %28, %cst_21 {dimension_numbers = #tpu.dot_dimension_numbers<[1], [0], [0], [1], [0, 0, 1, 1], [], []>} : vector<8x128xbf16>, vector<128x128xbf16>, vector<8x128xf32> -> vector<8x128xf32>
    %c0_22 = arith.constant 0 : index
    %c0_23 = arith.constant 0 : index
    %30 = vector.load %arg10[%c0_22, %c0_23] : memref<1x128xf32, #tpu.memory_space<vmem>>, vector<1x128xf32>
    %31 = vector.broadcast %30 : vector<1x128xf32> to vector<8x128xf32>
    %32 = arith.addf %29, %31 : vector<8x128xf32>
    %cst_24 = arith.constant 0.000000e+00 : f32
    %33 = vector.broadcast %cst_24 : f32 to vector<8x128xf32>
    %34 = arith.maximumf %32, %33 : vector<8x128xf32>
    %35 = arith.truncf %34 : vector<8x128xf32> to vector<8x128xbf16>
    %c0_25 = arith.constant 0 : index
    %c0_26 = arith.constant 0 : index
    %36 = vector.load %arg11[%c0_25, %c0_26] : memref<128x128xbf16, #tpu.memory_space<vmem>>, vector<128x128xbf16>
    %cst_27 = arith.constant dense<0.000000e+00> : vector<8x128xf32>
    %37 = tpu.matmul %35, %36, %cst_27 {dimension_numbers = #tpu.dot_dimension_numbers<[1], [0], [0], [1], [0, 0, 1, 1], [], []>} : vector<8x128xbf16>, vector<128x128xbf16>, vector<8x128xf32> -> vector<8x128xf32>
    %c0_28 = arith.constant 0 : index
    %c0_29 = arith.constant 0 : index
    %38 = vector.load %arg12[%c0_28, %c0_29] : memref<1x128xf32, #tpu.memory_space<vmem>>, vector<1x128xf32>
    %39 = vector.broadcast %38 : vector<1x128xf32> to vector<8x128xf32>
    %40 = arith.addf %37, %39 : vector<8x128xf32>
    %cst_30 = arith.constant 0.000000e+00 : f32
    %41 = vector.broadcast %cst_30 : f32 to vector<8x128xf32>
    %42 = arith.maximumf %40, %41 : vector<8x128xf32>
    %c1_i32 = arith.constant 1 : i32
    %43 = arith.muli %arg0, %c1_i32 : i32
    %44 = arith.addi %43, %arg1 : i32
    %c8_i32 = arith.constant 8 : i32
    %45 = arith.muli %44, %c8_i32 : i32
    %46 = tpu.iota {dimensions = array<i32: 0>} : vector<8x1xi32>
    %47 = vector.broadcast %45 : i32 to vector<8x1xi32>
    %48 = arith.addi %47, %46 : vector<8x1xi32>
    %c8_i32_31 = arith.constant 8 : i32
    %49 = vector.broadcast %c8_i32_31 : i32 to vector<8x1xi32>
    %50 = arith.cmpi slt, %48, %49 : vector<8x1xi32>
    %cst_32 = arith.constant 0.000000e+00 : f32
    %51 = vector.shape_cast %50 : vector<8x1xi1> to vector<8x1xi1>
    %52 = vector.broadcast %51 : vector<8x1xi1> to vector<8x128xi1>
    %53 = vector.broadcast %cst_32 : f32 to vector<8x128xf32>
    %54 = arith.select %52, %42, %53 : vector<8x128xi1>, vector<8x128xf32>
    %c0_33 = arith.constant 0 : index
    %c0_34 = arith.constant 0 : index
    %c0_35 = arith.constant 0 : index
    %55 = vector.load %arg13[%c0_33, %c0_34, %c0_35] : memref<1x1x128xf32, #tpu.memory_space<vmem>>, vector<1x1x128xf32>
    %cst_36 = arith.constant dense<0.000000e+00> : vector<128xf32>
    %56 = vector.multi_reduction <add>, %54, %cst_36 [0] : vector<8x128xf32> to vector<128xf32>
    %57 = vector.shape_cast %56 : vector<128xf32> to vector<1x128xf32>
    %58 = vector.shape_cast %57 : vector<1x128xf32> to vector<1x1x128xf32>
    %59 = arith.addf %55, %58 : vector<1x1x128xf32>
    %c0_37 = arith.constant 0 : index
    %c0_38 = arith.constant 0 : index
    %c0_39 = arith.constant 0 : index
    %60 = vector.load %arg13[%c0_37, %c0_38, %c0_39] : memref<1x1x128xf32, #tpu.memory_space<vmem>>, vector<1x1x128xf32>
    tpu.vector_store %arg13[%c0_37, %c0_38, %c0_39], %59 {strides = array<i32>} : memref<1x1x128xf32, #tpu.memory_space<vmem>>, vector<1x1x128xf32>,
    return
  }
  func.func @transform_0(%arg0: i32, %arg1: i32) -> (i32, i32) {
    %c1_i32 = arith.constant 1 : i32
    %0 = arith.muli %arg0, %c1_i32 : i32
    %1 = arith.addi %0, %arg1 : i32
    %c0_i32 = arith.constant 0 : i32
    %c0_i32_0 = arith.constant 0 : i32
    return %1, %c0_i32 : i32, i32
  }
  func.func @transform_1(%arg0: i32, %arg1: i32) -> (i32, i32) {
    %c0_i32 = arith.constant 0 : i32
    %c0_i32_0 = arith.constant 0 : i32
    %c0_i32_1 = arith.constant 0 : i32
    return %c0_i32, %c0_i32_0 : i32, i32
  }
  func.func @transform_2(%arg0: i32, %arg1: i32) -> (i32, i32) {
    %c0_i32 = arith.constant 0 : i32
    %c0_i32_0 = arith.constant 0 : i32
    %c0_i32_1 = arith.constant 0 : i32
    return %c0_i32, %c0_i32_0 : i32, i32
  }
  func.func @transform_3(%arg0: i32, %arg1: i32) -> (i32, i32) {
    %c0_i32 = arith.constant 0 : i32
    %c0_i32_0 = arith.constant 0 : i32
    %c0_i32_1 = arith.constant 0 : i32
    return %c0_i32, %c0_i32_0 : i32, i32
  }
  func.func @transform_4(%arg0: i32, %arg1: i32) -> (i32, i32) {
    %c0_i32 = arith.constant 0 : i32
    %c0_i32_0 = arith.constant 0 : i32
    %c0_i32_1 = arith.constant 0 : i32
    return %c0_i32, %c0_i32_0 : i32, i32
  }
  func.func @transform_5(%arg0: i32, %arg1: i32) -> (i32, i32) {
    %c0_i32 = arith.constant 0 : i32
    %c0_i32_0 = arith.constant 0 : i32
    %c0_i32_1 = arith.constant 0 : i32
    return %c0_i32, %c0_i32_0 : i32, i32
  }
  func.func @transform_6(%arg0: i32, %arg1: i32) -> (i32, i32) {
    %c0_i32 = arith.constant 0 : i32
    %c0_i32_0 = arith.constant 0 : i32
    %c0_i32_1 = arith.constant 0 : i32
    return %c0_i32, %c0_i32_0 : i32, i32
  }
  func.func @transform_7(%arg0: i32, %arg1: i32) -> (i32, i32) {
    %c0_i32 = arith.constant 0 : i32
    %c0_i32_0 = arith.constant 0 : i32
    %c0_i32_1 = arith.constant 0 : i32
    return %c0_i32, %c0_i32_0 : i32, i32
  }
  func.func @transform_8(%arg0: i32, %arg1: i32) -> (i32, i32) {
    %c0_i32 = arith.constant 0 : i32
    %c0_i32_0 = arith.constant 0 : i32
    %c0_i32_1 = arith.constant 0 : i32
    return %c0_i32, %c0_i32_0 : i32, i32
  }
  func.func @transform_9(%arg0: i32, %arg1: i32) -> (i32, i32) {
    %c0_i32 = arith.constant 0 : i32
    %c0_i32_0 = arith.constant 0 : i32
    %c0_i32_1 = arith.constant 0 : i32
    return %c0_i32, %c0_i32_0 : i32, i32
  }
  func.func @transform_10(%arg0: i32, %arg1: i32) -> (i32, i32) {
    %c0_i32 = arith.constant 0 : i32
    %c0_i32_0 = arith.constant 0 : i32
    %c0_i32_1 = arith.constant 0 : i32
    return %c0_i32, %c0_i32_0 : i32, i32
  }
  func.func @transform_11(%arg0: i32, %arg1: i32) -> (i32, i32, i32) {
    %c0_i32 = arith.constant 0 : i32
    %c0_i32_0 = arith.constant 0 : i32
    %c0_i32_1 = arith.constant 0 : i32
    return %arg0, %c0_i32, %c0_i32_0 : i32, i32, i32
  }
}

</mosaic_0001>

<bundles_post_ra>
// kernel: tpu_custom_call.1
= control target key start
LH: loop header
LB: loop body
LE: loop exit
PB: predicated region body
PF: predicated region fallthrough
CT: control target
= control target key end

     0   :  { %s1995_s0 = inlined_call_operand.vmem [shape: bf16[16,8], index: 0, kind: input, shape index: {}]   ;;  %s1996_s1 = inlined_call_operand.vmem [shape: bf16[8,128], index: 1, kind: input, shape index: {}]   ;;  %s1997_s2 = inlined_call_operand.vmem [shape: f32[1,128], index: 2, kind: input, shape index: {}]   ;;  %s1998_s3 = inlined_call_operand.hbm [shape: bf16[128,128], index: 3, kind: input, shape index: {}]   ;;  %s1999_s4 = inlined_call_operand.vmem [shape: f32[1,128], index: 4, kind: input, shape index: {}]   ;;  %s2000_s5 = inlined_call_operand.hbm [shape: bf16[128,128], index: 5, kind: input, shape index: {}]   ;;  %s2001_s6 = inlined_call_operand.vmem [shape: f32[1,128], index: 6, kind: input, shape index: {}]   ;;  %s2002_s7 = inlined_call_operand.hbm [shape: bf16[128,128], index: 7, kind: input, shape index: {}]   ;;  %s2003_s8 = inlined_call_operand.vmem [shape: f32[1,128], index: 8, kind: input, shape index: {}]   ;;  %s2004_s9 = inlined_call_operand.hbm [shape: bf16[128,128], index: 9, kind: input, shape index: {}]   ;;  %s2005_s10 = inlined_call_operand.vmem [shape: f32[1,128], index: 10, kind: input, shape index: {}]   ;;  %s2006_s11 = inlined_call_operand.hbm [shape: f32[2,1,128], index: 11, kind: output, shape index: {}]  }
   0x1   :  { %2021 = sst [smem:[#allocation23_spill]] %s2000_s5 }
   0x2   :  { %2022 = sst [smem:[#allocation24_spill]] %s2006_s11 }
   0x3   :  { %16 = vsyncpa [#allocation3], 0 }
   0x4   :  { %17 = vsyncpa [#allocation6], 0 }
   0x5   :  { %18 = vsyncpa [#allocation9], 0 }
   0x6   :  { %19 = vsyncpa [#allocation4], 0 }
   0x7   :  { %21 = vsyncpa [#allocation4 + $0x1], 0  ;;  %s1696_s17 = smov 0   ;;  %s1698_s18 = smov 0  }
   0x8   :  { %s1700_s19 = smov 0   ;;  %s1702_s20 = smov 0  }
   0x9   :  { %s1704_s21 = smov 0   ;;  %s1706_s22 = smov 0  }
   0xa LB: > { %2023 = sst [smem:[#allocation15_spill]] %s1605_s17  ;;  %s1111_s23 = sadd.s32 4294967295, %s1625_s22   ;;  %s1625_s22 = sphi %s1706_s22, %s27_s22   ;;  %s1621_s21 = sphi %s1704_s21, %s2050_s21   ;;  %s1617_s20 = sphi %s1702_s20, %s2053_s20   ;;  %s1613_s19 = sphi %s1700_s19, %s2048_s19   ;;  %s1609_s18 = sphi %s1698_s18, %s2052_s18   ;;  %s1605_s17 = sphi %s1696_s17, %s2051_s17  }
   0xb   : > { %2024 = sst [smem:[#allocation16_spill]] %s1613_s19  ;;  %s1112_s24 = sadd.s32 4294967294, %s1625_s22  }
   0xc   : > { %2025 = sst [smem:[#allocation17_spill]] %s1621_s21  ;;  %s39_s25 = sadd.s32 1, %s1621_s21 }
   0xd   : > { %2026 = sst [smem:[#allocation18_spill]] %s1625_s22  ;;  %s284_s26 = sadd.s32 1, %s1613_s19 }
   0xe   : > { %p41_p0 = scmp.ge.s32.totalorder %s39_s25, 2  ;;  %p294_p1 = scmp.ne.s32.totalorder %s1613_s19, %s1609_s18 }
   0xf   : > { %p295_p2 = scmp.eq.s32.totalorder %s1111_s23, 1  ;;  %p300_p3 = scmp.ne.s32.totalorder %s1609_s18, %s1605_s17 }
  0x10   : > { %s2055_s25 = smov (%p41_p0, %s39_s25), 0  ;;  %p301_p5 = scmp.eq.s32.totalorder %s1112_s24, 1 }
  0x11   : > { %2027 = sst [smem:[#allocation19_spill]] %s2055_s25  ;;  %p1736_p4 = por %p295_p2, %p294_p1 }
  0x12   : > { %s281_s28 = ssub.s32 %s1621_s21, %s2055_s25  ;;  %p1113_p6 = scmp.ge.s32.totalorder %s1625_s22, 1 }
  0x13   : > { %s2028_s27 = scalar_select %p1736_p4, 1, 0 }
  0x14   : > { %p282_p7 = scmp.eq.s32.totalorder %s281_s28, 0  ;;  %p1743_p8 = por %p301_p5, %p300_p3 }
  0x15   : > { %2029 = sst [smem:[#allocation20_spill]] %s2028_s27  ;;  %p308_p9 = scmp.lt.s32.totalorder %s1625_s22, 3 }
  0x16   : > { %s2030_s29 = scalar_select %p1743_p8, 1, 0 }
  0x17   : > { %s1749_s30 = scalar_select %p282_p7, %s1613_s19, %s284_s26  }
  0x18   : > { %2031 = sst [smem:[#allocation21_spill]] %s2030_s29  ;;  %p1751_p10 = pnand %p1113_p6, %p308_p9 }
  0x19   : > { %2032 = sst [smem:[#allocation22_spill]] %s1749_s30  ;;  %p1755_p11 = scmp.eq.s32.totalorder %s1111_s23, 0 }
  0x1a   : > { %s2033_s12 = scalar_select %p1751_p10, 1, 0 }
  0x1b   : > { %s2034_s13 = scalar_select %p1755_p11, 1, 0 }
  0x1c   : > { %p1309_p12 = pneg %p1751_p10  ;;  %s1627_s14 = smov [#allocation5]  }
  0x1d   : > { %s342_s15 = sshll.u32 %s1627_s14, 4  ;;  %s1628_s24 = smov [#allocation2]   ;;  %s343_s15 = int_to_ptr.vmem [resolvable:$true] %s342_s15 }
  0x1e   : > { %p1763_p13 = pnand %p1755_p11, %p1309_p12  ;;  %s326_s26 = sshll.u32 %s1628_s24, 4  ;;  %s327_s26 = int_to_ptr.vmem [resolvable:$true] %s326_s26 }
  0x1f   : > { %s2036_s5 = sld [smem:[#allocation23_spill]] }
  0x20   : > { %p1775_p1 = pneg %p1763_p13 }
  0x25   : > { %s1423_s23 = scalar_lea.hbm %s2036_s5, 1024 }
  0x26   : > { %p1424_p0 = scmp.ne.s32.totalorder %s2036_s5, %s1423_s23  ;;  %p1430_p5 = scmp.lt.u32.totalorder %s1423_s23, %s2036_s5 }
  0x28   : > { %p1426_p2 = pnand %p1775_p1, %p1424_p0 }
  0x2a   : > { %p1427_p3 = pneg %p1426_p2 }
  0x2c   : > { %p1432_p6 = pnand %p1430_p5, %p1427_p3 }
  0x2e   : > { %1435 = shalt.err (!%p1432_p6)
}
  0x2f   : > { %s1436_s25 = scalar_lea.vmem %s343_s15, 1024  ;;  %p1444_p8 = scmp.lt.s32.totalorder %s343_s15, %s343_s15 }
  0x30   : > { %p1437_p7 = scmp.ne.s32.totalorder %s343_s15, %s1436_s25  ;;  %p1445_p4 = scmp.lt.s32.totalorder %s1436_s25, %s1436_s25 }
  0x32   : > { %p1439_p9 = pnand %p1437_p7, %p1775_p1  ;;  %p1446_p11 = por %p1445_p4, %p1444_p8 }
  0x34   : > { %p1440_p12 = pneg %p1439_p9 }
  0x36   : > { %p1447_p10 = pnand %p1446_p11, %p1440_p12 }
  0x38   : > { %1450 = shalt.err (!%p1447_p10)
}
  0x39   : > { %s1629_s21 = smov 64   ;;  %s1630_s30 = smov 4  }
  0x3a   : > { %1315 = dma.hbm_to_vmem [thread:$0]  (!%p1763_p13), %s2036_s5, 1024, %s343_s15, [#allocation6], %s1629_s21, %s1629_s21, %s1630_s30  }
  0x3b   : > { %s1451_s23 = scalar_lea.hbm %s1998_s3, 1024 }
  0x3c   : > { %p1452_p4 = scmp.ne.s32.totalorder %s1998_s3, %s1451_s23  ;;  %p1458_p11 = scmp.lt.u32.totalorder %s1451_s23, %s1998_s3 }
  0x3e   : > { %p1454_p8 = pnand %p1452_p4, %p1775_p1 }
  0x40   : > { %p1455_p10 = pneg %p1454_p8 }
  0x42   : > { %p1460_p0 = pnand %p1458_p11, %p1455_p10 }
  0x44   : > { %1463 = shalt.err (!%p1460_p0)
}
  0x45   : > { %s1464_s19 = scalar_lea.vmem %s327_s26, 1024  ;;  %p1472_p6 = scmp.lt.s32.totalorder %s327_s26, %s327_s26 }
  0x46   : > { %p1465_p2 = scmp.ne.s32.totalorder %s327_s26, %s1464_s19  ;;  %p1473_p7 = scmp.lt.s32.totalorder %s1464_s19, %s1464_s19 }
  0x48   : > { %p1467_p3 = pnand %p1465_p2, %p1775_p1  ;;  %p1474_p9 = por %p1473_p7, %p1472_p6 }
  0x4a   : > { %p1468_p5 = pneg %p1467_p3 }
  0x4c   : > { %p1475_p12 = pnand %p1474_p9, %p1468_p5 }
  0x4e   : > { %1478 = shalt.err (!%p1475_p12)
}
  0x4f   : > { %1312 = dma.hbm_to_vmem [thread:$0]  (!%p1763_p13), %s1998_s3, 1024, %s327_s26, [#allocation3], %s1629_s21, %s1629_s21, %s1630_s30  }
  0x50   : > { %s1631_s22 = smov [#allocation7]   ;;  %s1632_s29 = smov [#allocation8]  }
  0x51   : > { %s358_s15 = sshll.u32 %s1631_s22, 4  ;;  %s374_s24 = sshll.u32 %s1632_s29, 4  ;;  %s359_s15 = int_to_ptr.vmem [resolvable:$true] %s358_s15  ;;  %s375_s24 = int_to_ptr.vmem [resolvable:$true] %s374_s24 }
  0x52   : > { %s1479_s25 = scalar_lea.hbm %s2002_s7, 1024 }
  0x53   : > { %p1480_p4 = scmp.ne.s32.totalorder %s2002_s7, %s1479_s25  ;;  %p1486_p11 = scmp.lt.u32.totalorder %s1479_s25, %s2002_s7 }
  0x55   : > { %p1482_p8 = pnand %p1480_p4, %p1775_p1 }
  0x57   : > { %p1483_p10 = pneg %p1482_p8 }
  0x59   : > { %p1488_p0 = pnand %p1486_p11, %p1483_p10 }
  0x5b   : > { %1491 = shalt.err (!%p1488_p0)
}
  0x5c   : > { %s1492_s26 = scalar_lea.vmem %s359_s15, 1024  ;;  %p1500_p6 = scmp.lt.s32.totalorder %s359_s15, %s359_s15 }
  0x5d   : > { %p1493_p2 = scmp.ne.s32.totalorder %s359_s15, %s1492_s26  ;;  %p1501_p7 = scmp.lt.s32.totalorder %s1492_s26, %s1492_s26 }
  0x5f   : > { %p1495_p3 = pnand %p1493_p2, %p1775_p1  ;;  %p1502_p9 = por %p1501_p7, %p1500_p6 }
  0x61   : > { %p1496_p5 = pneg %p1495_p3 }
  0x63   : > { %p1503_p12 = pnand %p1502_p9, %p1496_p5 }
  0x65   : > { %1506 = shalt.err (!%p1503_p12)
}
  0x66   : > { %1318 = dma.hbm_to_vmem [thread:$0]  (!%p1763_p13), %s2002_s7, 1024, %s359_s15, [#allocation6], %s1629_s21, %s1629_s21, %s1630_s30  }
  0x67   : > { %s1507_s29 = scalar_lea.hbm %s2004_s9, 1024 }
  0x68   : > { %p1508_p4 = scmp.ne.s32.totalorder %s2004_s9, %s1507_s29  ;;  %p1514_p11 = scmp.lt.u32.totalorder %s1507_s29, %s2004_s9 }
  0x6a   : > { %p1510_p8 = pnand %p1508_p4, %p1775_p1 }
  0x6c   : > { %p1511_p10 = pneg %p1510_p8 }
  0x6e   : > { %p1516_p0 = pnand %p1514_p11, %p1511_p10 }
  0x70   : > { %1519 = shalt.err (!%p1516_p0)
}
  0x71   : > { %s1520_s11 = scalar_lea.vmem %s375_s24, 1024  ;;  %p1528_p6 = scmp.lt.s32.totalorder %s375_s24, %s375_s24 }
  0x72   : > { %p1521_p2 = scmp.ne.s32.totalorder %s375_s24, %s1520_s11  ;;  %p1529_p7 = scmp.lt.s32.totalorder %s1520_s11, %s1520_s11 }
  0x74   : > { %p1523_p3 = pnand %p1521_p2, %p1775_p1  ;;  %p1530_p9 = por %p1529_p7, %p1528_p6 }
  0x76   : > { %p1524_p5 = pneg %p1523_p3 }
  0x78   : > { %p1531_p12 = pnand %p1530_p9, %p1524_p5 }
  0x7a   : > { %1534 = shalt.err (!%p1531_p12)
}
  0x7b   : > { %1321 = dma.hbm_to_vmem [thread:$0]  (!%p1763_p13), %s2004_s9, 1024, %s375_s24, [#allocation9], %s1629_s21, %s1629_s21, %s1630_s30  }
  0x7c   : > { %p2038_p4 = scmp.ne.s32.totalorder %s2033_s12, 0 }
  0x7d   : > { %p2039_p1 = scmp.ne.s32.totalorder (!%p2038_p4), %s2034_s13, 0 }
  0x7e   : > { %402 = sbr.rel (%p2038_p4) target bundleno = 1262 (0x4ee), region = 64 }
  0x85   : > { %1588 = dma.done.wait (%p2039_p1), [#allocation3], 1024  }
  0x86   : > { %1590 = vsyncadd (%p2039_p1), [#allocation3], 4294966272 }
  0x87   : > { %1592 = dma.done.wait (%p2039_p1), [#allocation6], 2048  }
  0x88   : > { %1594 = vsyncadd (%p2039_p1), [#allocation6], 4294965248 }
  0x89   : > { %1596 = dma.done.wait (%p2039_p1), [#allocation9], 1024  }
  0x8a   : > { %1598 = vsyncadd (%p2039_p1), [#allocation9], 4294966272  ;;  %p454_p13 = scmp.lt.s32.totalorder %s1617_s20, 1  ;;  %v1633_v0 = vmov 0.0   ;;  %vm1634_vm0 = vmmov 0   ;;  %vm478_vm1 = vcmask 1043456  }
  0x8b   : > { %1205 = vmatprep.subr.bf16.mxu0 %v1633_v0  ;;  %1207 = vmatprep.mubr.msk.bf16.mxu0 %vm1634_vm0, %v1633_v0  ;;  %v466_v1 = vld [vmem:[%s1996_s1] sm:$0xf]  ;;  %vm474_vm2 = vcmask 64512   ;;  %v1391_v3 = vld [vmem:[#allocation2] sm:$0xff]   ;;  %v1392_v5 = vld [vmem:[#allocation2 + $0x8] sm:$0xff]   ;;  %s451_s19 = sand.u32 1, %s1609_s18  }
  0x8c   : > { %s455_s12 = scalar_select %p454_p13, %s1617_s20, 1  ;;  %1211 = vmatprep.subr.bf16.mxu1 %v1633_v0  ;;  %1227 = vmatprep.mubr.msk.bf16.mxu1 %vm1634_vm0, %v1633_v0  ;;  %v480_v2 = vsel %vm478_vm1, %v466_v1, 0  ;;  %v1393_v6 = vld [vmem:[#allocation2 + $0x10] sm:$0xff]   ;;  %v1394_v7 = vld [vmem:[#allocation2 + $0x18] sm:$0xff]   ;;  %v1395_v8 = vld [vmem:[#allocation2 + $0x20] sm:$0xff]  }
  0x8d   : > { %1206 = vmatpush3.bf16.msra.mxu0 %v480_v2  ;;  %1212 = vmatpush3.bf16.msra.mxu1 %v1391_v3  ;;  %v1396_v9 = vld [vmem:[#allocation2 + $0x28] sm:$0xff]   ;;  %v1397_v10 = vld [vmem:[#allocation2 + $0x30] sm:$0xff]   ;;  %v1398_v11 = vld [vmem:[#allocation2 + $0x38] sm:$0xff]   ;;  %s452_s11 = scalar_lea.vmem [#allocation10], %s451_s19  ;;  %s1163_s15 = sshll.u32 %s1617_s20, 3 }
  0x8e   : > { %s1124_s16 = sshll.u32 %s455_s12, 2  ;;  %1231 = vmatprep.subr.bf16.mxu0 %v1633_v0  ;;  %1213 = vmatprep.subr.bf16.mxu1 %v1633_v0  ;;  %v1399_v12 = vld [vmem:[#allocation5] sm:$0xff]   ;;  %v1400_v13 = vld [vmem:[#allocation5 + $0x8] sm:$0xff]   ;;  %v1401_v14 = vld [vmem:[#allocation5 + $0x10] sm:$0xff]   ;;  %464 = vst [vmem:[%s452_s11] sm:$0x1] %v1633_v0  ;;  %s1164_s13 = sshll.u32 %s1617_s20, 4 }
  0x8f   : > { %s457_s21 = scalar_lea.vmem %s1995_s0, %s1124_s16  ;;  %v1402_v15 = vld [vmem:[#allocation5 + $0x18] sm:$0xff]   ;;  %v1403_v16 = vld [vmem:[#allocation5 + $0x20] sm:$0xff]   ;;  %v1404_v17 = vld [vmem:[#allocation5 + $0x28] sm:$0xff]   ;;  %s2040_s16 = sld [smem:[#allocation20_spill]] }
  0x90   : > { %v465_v4 = vld [vmem:[%s457_s21] sm:$0xf]  ;;  %v1406_v27 = vld [vmem:[#allocation5 + $0x38] sm:$0xff]   ;;  %v1407_v28 = vld [vmem:[#allocation7] sm:$0xff]   ;;  %s1007_s14 = sshll.u32 %s452_s11, 4  ;;  %s2041_s24 = sld [smem:[#allocation24_spill]]  ;;  %s1948_s14 = int_to_ptr.vmem [resolvable:$true] %s1007_s14 }
  0x91   : > { %1208 = vmatmul.mubr.msk.bf16.vlgmr.msra.gmra.mrb[0].mxu0 %vm474_vm2, %v465_v4  ;;  %1214 = vmatpush3.bf16.msra.mxu1 %v1392_v5  ;;  %v1125_v18 = vld [vmem:[%s1997_s2] ss:$0 sm:$0xff]  ;;  %v1408_v29 = vld [vmem:[#allocation7 + $0x8] sm:$0xff]   ;;  %v1410_v31 = vld [vmem:[#allocation7 + $0x18] sm:$0xff]   ;;  %v977_v5 = vlaneseq  ;;  %s995_s27 = scalar_lea.sflag [#allocation4], %s451_s19  ;;  %s1535_s17 = scalar_lea.vmem %s1948_s14, 16 }
  0x92   : > { %1247 = vmatprep.mubr.msk.bf16.mxu0 %vm1634_vm0, %v1633_v0  ;;  %1215 = vmatprep.subr.bf16.mxu1 %v1633_v0  ;;  %v1405_v26 = vld [vmem:[#allocation5 + $0x30] sm:$0xff]   ;;  %v1411_v32 = vld [vmem:[#allocation7 + $0x20] sm:$0xff]   ;;  %v1412_v33 = vld [vmem:[#allocation7 + $0x28] sm:$0xff]   ;;  %p1536_p8 = scmp.ne.s32.totalorder %s1948_s14, %s1535_s17  ;;  %s1635_s20 = smov [#allocation10]  }
  0x93   : > { %1232 = vmatpush3.bf16.msra.mxu0 %v1399_v12  ;;  %v1409_v30 = vld [vmem:[#allocation7 + $0x10] sm:$0xff]   ;;  %v1414_v43 = vld [vmem:[#allocation7 + $0x38] sm:$0xff]   ;;  %v1415_v44 = vld [vmem:[#allocation8] sm:$0xff]   ;;  %s1539_s22 = sshll.u32 %s1635_s20, 4  ;;  %s1540_s22 = int_to_ptr.vmem [resolvable:$false] %s1539_s22 }
  0x94   : > { %1233 = vmatprep.subr.bf16.mxu0 %v1633_v0  ;;  %v1127_v34 = vld [vmem:[%s1999_s4] ss:$0 sm:$0xff]  ;;  %v1416_v45 = vld [vmem:[#allocation8 + $0x8] sm:$0xff]   ;;  %v1418_v47 = vld [vmem:[#allocation8 + $0x18] sm:$0xff]   ;;  %s1541_s29 = scalar_lea.vmem %s1540_s22, 32  ;;  %p1542_p2 = scmp.lt.s32.totalorder %s1948_s14, %s1540_s22 }
  0x95   : > { %1216 = vmatpush3.bf16.msra.mxu1 %v1393_v6  ;;  %v1413_v42 = vld [vmem:[#allocation7 + $0x30] sm:$0xff]   ;;  %v1419_v48 = vld [vmem:[#allocation8 + $0x20] sm:$0xff]   ;;  %v1420_v49 = vld [vmem:[#allocation8 + $0x28] sm:$0xff]   ;;  %v978_v6 = vshrl.u32 %v977_v5, 7  ;;  %p2042_p10 = scmp.ne.s32.totalorder %s2040_s16, 0  ;;  %p1543_p3 = scmp.lt.s32.totalorder %s1541_s29, %s1535_s17 }
  0x96   : > { %1217 = vmatprep.subr.bf16.mxu1 %v1633_v0  ;;  %v1417_v46 = vld [vmem:[#allocation8 + $0x10] sm:$0xff]   ;;  %v1422_v59 = vld [vmem:[#allocation8 + $0x38] sm:$0xff]   ;;  %s1946_s5 = scalar_lea.hbm %s2041_s24, %s1164_s13 }
  0x97   : > { %1234 = vmatpush3.bf16.msra.mxu0 %v1400_v13  ;;  %v1136_v50 = vld [vmem:[%s2001_s6] ss:$0 sm:$0xff]  ;;  %p1537_p11 = pnand %p1536_p8, %p2042_p10  ;;  %p1544_p5 = por %p1543_p3, %p1542_p2 }
  0x98   : > { %1235 = vmatprep.subr.bf16.mxu0 %v1633_v0  ;;  %v1421_v58 = vld [vmem:[#allocation8 + $0x30] sm:$0xff]  }
  0x99   : > { %1218 = vmatpush3.bf16.msra.mxu1 %v1394_v7  ;;  %v1145_v60 = vld [vmem:[%s2003_s8] ss:$0 sm:$0xff]  ;;  %v979_v7 = vstv %s1163_s15  ;;  %p1538_p0 = pneg %p1537_p11 }
  0x9a   : > { %1219 = vmatprep.subr.bf16.mxu1 %v1633_v0 }
  0x9b   : > { %1236 = vmatpush3.bf16.msra.mxu0 %v1401_v14  ;;  %p1545_p6 = pnand %p1544_p5, %p1538_p0 }
  0x9c   : > { %1237 = vmatprep.subr.bf16.mxu0 %v1633_v0 }
  0x9d   : > { %1220 = vmatpush3.bf16.msra.mxu1 %v1395_v8  ;;  %v1154_v8 = vld [vmem:[%s2005_s10] ss:$0 sm:$0xff] }
  0x9e   : > { %1221 = vmatprep.subr.bf16.mxu1 %v1633_v0 }
  0x9f   : > { %1238 = vmatpush3.bf16.msra.mxu0 %v1402_v15 }
  0xa0   : > { %1239 = vmatprep.subr.bf16.mxu0 %v1633_v0 }
  0xa1   : > { %1222 = vmatpush3.bf16.msra.mxu1 %v1396_v9  ;;  %v980_v9 = vadd.s32 %v979_v7, %v978_v6 }
  0xa2   : > { %1223 = vmatprep.subr.bf16.mxu1 %v1633_v0 }
  0xa3   : > { %1240 = vmatpush3.bf16.msra.mxu0 %v1403_v16  ;;  %vm981_vm3 = vcmp.lt.s32.totalorder %v980_v9, 8 }
  0xa4   : > { %1241 = vmatprep.subr.bf16.mxu0 %v1633_v0 }
  0xa5   : > { %1224 = vmatpush3.bf16.msra.mxu1 %v1397_v10 }
  0xa6   : > { %1225 = vmatprep.subr.bf16.mxu1 %v1633_v0 }
  0xa7   : > { %1242 = vmatpush3.bf16.msra.mxu0 %v1404_v17 }
  0xa8   : > { %1243 = vmatprep.subr.bf16.mxu0 %v1633_v0 }
  0xa9   : > { %1226 = vmatpush3.bf16.msra.mxu1 %v1398_v11 }
  0xaa   : > { %1251 = vmatprep.subr.bf16.mxu1 %v1633_v0 }
  0xab   : > { %1244 = vmatpush3.bf16.msra.mxu0 %v1405_v26 }
  0xac   : > { %1245 = vmatprep.subr.bf16.mxu0 %v1633_v0 }
  0xaf   : > { %1246 = vmatpush3.bf16.msra.mxu0 %v1406_v27 }
  0xb0   : > { %1271 = vmatprep.subr.bf16.mxu0 %v1633_v0 }
 0x164   : > { %v516_v19 = vpop.f32.mrb[0].mxu0 }
 0x165   : > { %v517_v20 = vadd.f32 %v1125_v18, %v516_v19  ;;  %v1209_v21 = vpop.f32.mrb[1].mxu0 }
 0x166   : > { %v519_v22 = vpop.f32.mrb[2].mxu0  ;;  %v985_v21 = vld [vmem:[%s452_s11] sm:$0x1] }
 0x167   : > { %v522_v23 = vmax.f32 %v517_v20, 0.0  ;;  %v1210_v24 = vpop.f32.mrb[3].mxu0 }
 0x169   : > { %v523_v25 = vpack.c.bf16 %v522_v23, %v522_v23 }
 0x16b   : > { %1228 = vmatmul.mubr.bf16.vlgmr.msra.gmra.mrb[0].mxu1 %v523_v25 }
 0x16c   : > { %1267 = vmatprep.mubr.msk.bf16.mxu1 %vm1634_vm0, %v1633_v0  ;;  %1252 = vmatpush3.bf16.msra.mxu1 %v1407_v28 }
 0x16d   : > { %1253 = vmatprep.subr.bf16.mxu1 %v1633_v0 }
 0x170   : > { %1254 = vmatpush3.bf16.msra.mxu1 %v1408_v29 }
 0x171   : > { %1255 = vmatprep.subr.bf16.mxu1 %v1633_v0 }
 0x174   : > { %1256 = vmatpush3.bf16.msra.mxu1 %v1409_v30 }
 0x175   : > { %1257 = vmatprep.subr.bf16.mxu1 %v1633_v0 }
 0x178   : > { %1258 = vmatpush3.bf16.msra.mxu1 %v1410_v31 }
 0x179   : > { %1259 = vmatprep.subr.bf16.mxu1 %v1633_v0 }
 0x17c   : > { %1260 = vmatpush3.bf16.msra.mxu1 %v1411_v32 }
 0x17d   : > { %1261 = vmatprep.subr.bf16.mxu1 %v1633_v0 }
 0x180   : > { %1262 = vmatpush3.bf16.msra.mxu1 %v1412_v33 }
 0x181   : > { %1263 = vmatprep.subr.bf16.mxu1 %v1633_v0 }
 0x184   : > { %1264 = vmatpush3.bf16.msra.mxu1 %v1413_v42 }
 0x185   : > { %1265 = vmatprep.subr.bf16.mxu1 %v1633_v0 }
 0x188   : > { %1266 = vmatpush3.bf16.msra.mxu1 %v1414_v43 }
 0x23e   : > { %v629_v35 = vpop.f32.mrb[0].mxu1 }
 0x23f   : > { %v630_v36 = vadd.f32 %v1127_v34, %v629_v35  ;;  %v1229_v37 = vpop.f32.mrb[1].mxu1 }
 0x240   : > { %v632_v38 = vpop.f32.mrb[2].mxu1 }
 0x241   : > { %v635_v39 = vmax.f32 %v630_v36, 0.0  ;;  %v1230_v40 = vpop.f32.mrb[3].mxu1 }
 0x243   : > { %v636_v41 = vpack.c.bf16 %v635_v39, %v635_v39 }
 0x245   : > { %1248 = vmatmul.mubr.bf16.vlgmr.msra.gmra.mrb[4].mxu0 %v636_v41 }
 0x246   : > { %1287 = vmatprep.mubr.msk.bf16.mxu0 %vm1634_vm0, %v1633_v0  ;;  %1272 = vmatpush3.bf16.msra.mxu0 %v1415_v44 }
 0x247   : > { %1273 = vmatprep.subr.bf16.mxu0 %v1633_v0 }
 0x24a   : > { %1274 = vmatpush3.bf16.msra.mxu0 %v1416_v45 }
 0x24b   : > { %1275 = vmatprep.subr.bf16.mxu0 %v1633_v0 }
 0x24e   : > { %1276 = vmatpush3.bf16.msra.mxu0 %v1417_v46 }
 0x24f   : > { %1277 = vmatprep.subr.bf16.mxu0 %v1633_v0 }
 0x252   : > { %1278 = vmatpush3.bf16.msra.mxu0 %v1418_v47 }
 0x253   : > { %1279 = vmatprep.subr.bf16.mxu0 %v1633_v0 }
 0x256   : > { %1280 = vmatpush3.bf16.msra.mxu0 %v1419_v48 }
 0x257   : > { %1281 = vmatprep.subr.bf16.mxu0 %v1633_v0 }
 0x25a   : > { %1282 = vmatpush3.bf16.msra.mxu0 %v1420_v49 }
 0x25b   : > { %1283 = vmatprep.subr.bf16.mxu0 %v1633_v0 }
 0x25e   : > { %1284 = vmatpush3.bf16.msra.mxu0 %v1421_v58 }
 0x25f   : > { %1285 = vmatprep.subr.bf16.mxu0 %v1633_v0 }
 0x262   : > { %1286 = vmatpush3.bf16.msra.mxu0 %v1422_v59 }
 0x318   : > { %v742_v51 = vpop.f32.mrb[4].mxu0 }
 0x319   : > { %v743_v52 = vadd.f32 %v1136_v50, %v742_v51  ;;  %v1249_v53 = vpop.f32.mrb[5].mxu0 }
 0x31a   : > { %v745_v54 = vpop.f32.mrb[6].mxu0 }
 0x31b   : > { %v748_v55 = vmax.f32 %v743_v52, 0.0  ;;  %v1250_v56 = vpop.f32.mrb[7].mxu0 }
 0x31d   : > { %v749_v57 = vpack.c.bf16 %v748_v55, %v748_v55 }
 0x31f   : > { %1268 = vmatmul.mubr.bf16.vlgmr.msra.gmra.mrb[4].mxu1 %v749_v57 }
 0x3f2   : > { %v855_v61 = vpop.f32.mrb[4].mxu1 }
 0x3f3   : > { %v856_v62 = vadd.f32 %v1145_v60, %v855_v61  ;;  %v1269_v63 = vpop.f32.mrb[5].mxu1 }
 0x3f4   : > { %v858_v1 = vpop.f32.mrb[6].mxu1 }
 0x3f5   : > { %v861_v2 = vmax.f32 %v856_v62, 0.0  ;;  %v1270_v3 = vpop.f32.mrb[7].mxu1 }
 0x3f7   : > { %v862_v4 = vpack.c.bf16 %v861_v2, %v861_v2 }
 0x3f9   : > { %1288 = vmatmul.mubr.bf16.vlgmr.msra.gmra.mrb[8].mxu0 %v862_v4 }
 0x4cc   : > { %v968_v10 = vpop.f32.mrb[8].mxu0 }
 0x4cd   : > { %v969_v11 = vadd.f32 %v1154_v8, %v968_v10  ;;  %v1289_v12 = vpop.f32.mrb[9].mxu0 }
 0x4ce   : > { %v971_v13 = vpop.f32.mrb[10].mxu0 }
 0x4cf   : > { %v974_v14 = vmax.f32 %v969_v11, 0.0  ;;  %v1290_v15 = vpop.f32.mrb[11].mxu0 }
 0x4d1   : > { %v984_v16 = vsel %vm981_vm3, %v974_v14, 0.0 }
 0x4d2   : > { %v986_v0 = vrot.slane %v984_v16, 4 }
 0x4d4   : > { %v987_v17 = vadd.f32 %v986_v0, %v984_v16 }
 0x4d6   : > { %v988_v18 = vrot.slane %v987_v17, 2 }
 0x4d8   : > { %v989_v19 = vadd.f32 %v988_v18, %v987_v17 }
 0x4da   : > { %v990_v20 = vrot.slane %v989_v19, 1 }
 0x4dc   : > { %v991_v22 = vadd.f32 %v990_v20, %v989_v19 }
 0x4de   : > { %v992_v23 = vadd.f32 %v991_v22, %v985_v21 }
 0x4e0   : > { %993 = vst [vmem:[%s452_s11] sm:$0x1] %v992_v23 }
 0x4e1   : > { %1548 = shalt.err (!%p1545_p6)
}
 0x4e2   : > { %s1549_s28 = scalar_lea.hbm %s1946_s5, 16  ;;  %s1553_s19 = scalar_lea.hbm %s2041_s24, 32 }
 0x4e3   : > { %p1550_p7 = scmp.ne.s32.totalorder %s1946_s5, %s1549_s28  ;;  %p1554_p4 = scmp.lt.u32.totalorder %s1946_s5, %s2041_s24 }
 0x4e4   : > { %p1555_p1 = scmp.lt.u32.totalorder %s1553_s19, %s1549_s28  ;;  %p1557_p8 = scmp.lt.u32.totalorder %s1549_s28, %s1946_s5 }
 0x4e5   : > { %p1551_p9 = pnand %p1550_p7, %p2042_p10 }
 0x4e6   : > { %p1556_p13 = por %p1555_p1, %p1554_p4 }
 0x4e7   : > { %p1552_p12 = pneg %p1551_p9 }
 0x4e8   : > { %p1558_p11 = por %p1557_p8, %p1556_p13 }
 0x4ea   : > { %p1559_p0 = pnand %p1558_p11, %p1552_p12 }
 0x4ec   : > { %1562 = shalt.err (!%p1559_p0)
}
 0x4ed   : > { %1307 = dma.vmem_to_hbm [thread:$0]  (%p2042_p10), %s1948_s14, 16, %s1946_s5, %s995_s27  }
 0x4ee PF: > { %s2043_s26 = sld [smem:[#allocation18_spill]]  ;;  %s2044_s12 = sld [smem:[#allocation15_spill]] }
 0x4ef   : > { %s2045_s13 = sld [smem:[#allocation21_spill]] }
 0x4f4   : > { %p1334_p2 = scmp.ge.s32.totalorder %s2043_s26, 2  ;;  %s1019_s21 = sand.u32 1, %s2044_s12  }
 0x4f5   : > { %p2046_p3 = scmp.ne.s32.totalorder %s2045_s13, 0  ;;  %s1020_s30 = scalar_lea.sflag [#allocation4], %s1019_s21 }
 0x4f7   : > { %p1323_p5 = pnand %p1334_p2, %p2046_p3 }
 0x4f9   : > { %1600 = dma.done.wait (!%p1323_p5), %s1020_s30, 16  }
 0x4fa   : > { %1602 = vsyncadd (!%p1323_p5), %s1020_s30, 4294967280  ;;  %s27_s22 = sadd.s32 1, %s2043_s26   ;;  %s2047_s20 = sld [smem:[#allocation16_spill]] }
 0x4fb   : > { %p24_p6 = scmp.ge.s32.totalorder %s27_s22, 4   ;;  %s2048_s19 = sld [smem:[#allocation22_spill]] }
 0x4fc   : > { %s2049_s16 = sld [smem:[#allocation17_spill]]  ;;  %s2050_s21 = sld [smem:[#allocation19_spill]] }
 0x4fd   : > { %s2051_s17 = smov %s1609_s18  ;;  %26 = sbr.rel (!%p24_p6) target bundleno = 10 (0xa), region = 120 }
 0x500   : > { %s2052_s18 = smov %s2047_s20 }
 0x502   : > { %s2053_s20 = smov %s2049_s16 }
 0x504   :  { %1024 = vsyncpa [#allocation3], 1 }
 0x505   :  { %1026 = vsyncpa [#allocation3 + $0x1], 1 }
 0x506   :  { %1027 = vsyncpa [#allocation6], 1 }
 0x507   :  { %1028 = vsyncpa [#allocation9], 1 }
 0x508   :  { %1029 = vsyncpa [#allocation4], 1 }
 0x509   :  { %1031 = vsyncpa [#allocation4 + $0x1], 1 }

</bundles_post_ra>
